<compile_context>
chip_gen: v6e
topology: v6e:2x2x1
jax: 0.10.0
libtpu: 0.0.40
codegen_flags: <defaults>
</compile_context>

<pallas_src>
import math

import jax
import jax.numpy as jnp
from jax.experimental import pallas as pl
from jax.experimental.pallas import tpu as pltpu


# ---------------------------------------------------------------------------
# route_args: pure-Python glue, identical semantics to the PyTorch version.
# ---------------------------------------------------------------------------
def route_args(router, args, depth):
    routed_args = [(dict(), dict()) for _ in range(depth)]
    matched_keys = [key for key in args.keys() if key in router]
    for key in matched_keys:
        val = args[key]
        for d, ((f_args, g_args), routes) in enumerate(zip(routed_args, router[key])):
            new_f_args, new_g_args = map(lambda route: {key: val} if route else {}, routes)
            routed_args[d] = ({**f_args, **new_f_args}, {**g_args, **new_g_args})
    return routed_args


_WEIGHT_ORDER = ("wqkv", "wo", "w1", "w2")


# ---------------------------------------------------------------------------
# Pallas kernel: grid = (batch, depth).  One grid step == one (f, g) residual
# block applied to one batch slice.  The output block (1, N, D) has a constant
# index over the depth axis, so it stays resident in VMEM and doubles as the
# residual accumulator; x is DMA'd into it once at layer 0.
# ---------------------------------------------------------------------------
def _depth_fused_kernel(x_hbm, vec_ref, wqkv_ref, wo_ref, w1_ref, w2_ref,
                        o_ref, copy_sem):
    b = pl.program_id(0)
    layer = pl.program_id(1)
    N, D = o_ref.shape[1], o_ref.shape[2]
    H = w1_ref.shape[2]

    # Layer 0 of each batch slice: DMA the input rows straight from HBM into
    # the resident output block (no separate x input block, no acc scratch).
    @pl.when(layer == 0)
    def _():
        cp = pltpu.make_async_copy(x_hbm.at[b], o_ref.at[0], copy_sem.at[0])
        cp.start()
        cp.wait()

    x = o_ref[0]                                   # (N, D) resident accumulator
    vecs = vec_ref[0]                              # (8, VDIM) packed f32 vectors
    ln1_g, ln1_b = vecs[0:1, :D], vecs[1:2, :D]
    ln2_g, ln2_b = vecs[2:3, :D], vecs[3:4, :D]
    bias1, bias2 = vecs[4:5, :H], vecs[5:6, :D]

    def layer_norm(h, g, beta):                    # f32 elementwise
        mu = jnp.mean(h, axis=-1, keepdims=True)
        var = jnp.mean(jnp.square(h - mu), axis=-1, keepdims=True)
        return (h - mu) * jax.lax.rsqrt(var + 1e-5) * g + beta

    # ---- f: PreNorm + single-head self-attention --------------------------
    xn = layer_norm(x, ln1_g, ln1_b)
    qkv = jnp.dot(xn.astype(jnp.bfloat16), wqkv_ref[0],
                  preferred_element_type=jnp.float32)       # (N, 3D); q pre-scaled
    q = qkv[:, 0:D].astype(jnp.bfloat16)
    k = qkv[:, D:2 * D].astype(jnp.bfloat16)
    v = qkv[:, 2 * D:3 * D].astype(jnp.bfloat16)

    # TODO(synk): flash/kv-tile this (N,N) softmax for production sequence lengths.
    s = jax.lax.dot_general(q, k, (((1,), (1,)), ((), ())),
                            preferred_element_type=jnp.float32)   # (N, N)
    s = s - jnp.max(s, axis=-1, keepdims=True)
    p = jnp.exp(s)
    p = p * pl.reciprocal(jnp.sum(p, axis=-1, keepdims=True), approx=True)
    ctx = jnp.dot(p.astype(jnp.bfloat16), v,
                  preferred_element_type=jnp.float32)             # (N, D)
    attn = jnp.dot(ctx.astype(jnp.bfloat16), wo_ref[0],
                   preferred_element_type=jnp.float32)            # (N, D)
    x = x + attn

    # ---- g: PreNorm + FeedForward (Linear -> GELU -> Linear) ---------------
    xn2 = layer_norm(x, ln2_g, ln2_b)
    # TODO(synk): tile w1/w2 over the hidden dim for production H (~3072).
    h = jnp.dot(xn2.astype(jnp.bfloat16), w1_ref[0],
                preferred_element_type=jnp.float32) + bias1
    # TODO(synk): torch nn.GELU defaults to exact erf GELU; tanh approximation here.
    h = jax.nn.gelu(h)
    ff = jnp.dot(h.astype(jnp.bfloat16), w2_ref[0],
                 preferred_element_type=jnp.float32) + bias2
    x = x + ff

    o_ref[0] = x.astype(o_ref.dtype)


# ---------------------------------------------------------------------------
# Host-side parameter packing: stack per-layer params along depth, fold the
# attention scale into Wqkv's q columns, and pack the six small vectors into
# one (depth, 8, max(D,H)) f32 array.
# ---------------------------------------------------------------------------
def _stack_params(layers_params, dim, hidden):
    vdim = max(dim, hidden)
    scale = 1.0 / math.sqrt(dim)

    def pad_row(v, width):
        v = jnp.asarray(v, jnp.float32).reshape(1, -1)
        return jnp.pad(v, ((0, 0), (0, width - v.shape[1])))

    vec_rows = []
    weights = {n: [] for n in _WEIGHT_ORDER}
    for lp in layers_params:
        vec_rows.append(jnp.concatenate([
            pad_row(lp["ln1_g"], vdim), pad_row(lp["ln1_b"], vdim),
            pad_row(lp["ln2_g"], vdim), pad_row(lp["ln2_b"], vdim),
            pad_row(lp["b1"], vdim), pad_row(lp["b2"], vdim),
            jnp.zeros((2, vdim), jnp.float32)], axis=0))            # (8, vdim)
        # Fold 1/sqrt(D) into the q columns (one-time, on weights).
        wqkv = lp["wqkv"].astype(jnp.float32)
        wqkv = wqkv.at[:, :dim].multiply(scale).astype(jnp.bfloat16)
        weights["wqkv"].append(wqkv)
        weights["wo"].append(lp["wo"].astype(jnp.bfloat16))
        weights["w1"].append(lp["w1"].astype(jnp.bfloat16))
        weights["w2"].append(lp["w2"].astype(jnp.bfloat16))

    vecs = jnp.stack(vec_rows, axis=0)                              # (depth, 8, vdim)
    stacked = {n: jnp.stack(weights[n], axis=0) for n in _WEIGHT_ORDER}
    return vecs, stacked


def sequential_sequence_forward(x, layers_params, args_route={}, **kwargs):
    depth = len(layers_params)
    assert all(len(route) == depth for route in args_route.values()), \
        'each argument route map must have the same depth as the number of sequential layers'
    _routed = route_args(args_route, kwargs, depth)   # host-side glue
    # TODO(synk): routed runtime kwargs (e.g. attention masks) are not threaded
    # into the kernel; the default args_route={} path matches the reference.

    B, N, D = x.shape
    H = layers_params[0]["w1"].shape[-1]
    VDIM = max(D, H)
    vecs, wts = _stack_params(layers_params, D, H)

    # Explicit VMEM budget: resident activation block + double-buffered bf16
    # weight stream + packed vectors, with headroom.
    wt_bytes = 2 * 2 * (D * 3 * D + D * D + D * H + H * D)   # bf16, 2 buffers
    vec_bytes = 2 * 8 * VDIM * 4
    act_bytes = 2 * N * D * 4
    vmem_limit = int(min(max(2 * (wt_bytes + vec_bytes + act_bytes) + (8 << 20),
                             16 << 20), 100 << 20))

    return pl.pallas_call(
        _depth_fused_kernel,
        out_shape=jax.ShapeDtypeStruct((B, N, D), x.dtype),
        grid=(B, depth),
        in_specs=[
            pl.BlockSpec(memory_space=pl.ANY),                        # x stays in HBM
            pl.BlockSpec((1, 8, VDIM), lambda b, l: (l, 0, 0)),       # packed vectors
            pl.BlockSpec((1, D, 3 * D), lambda b, l: (l, 0, 0)),      # wqkv
            pl.BlockSpec((1, D, D), lambda b, l: (l, 0, 0)),          # wo
            pl.BlockSpec((1, D, H), lambda b, l: (l, 0, 0)),          # w1
            pl.BlockSpec((1, H, D), lambda b, l: (l, 0, 0)),          # w2
        ],
        out_specs=pl.BlockSpec((1, N, D), lambda b, l: (b, 0, 0)),    # resident over depth
        scratch_shapes=[pltpu.SemaphoreType.DMA((1,))],
        compiler_params=pltpu.CompilerParams(
            dimension_semantics=("parallel", "arbitrary"),
            vmem_limit_bytes=vmem_limit),
    )(x, vecs, wts["wqkv"], wts["wo"], wts["w1"], wts["w2"])


# ---------------------------------------------------------------------------
# Deterministic synthetic parameters (bf16 weights, f32 norms/biases)
# ---------------------------------------------------------------------------
def init_layer_params(key, dim, hidden):
    ks = jax.random.split(key, 6)
    scale = 0.02

    def w(k, shape):
        return (scale * jax.random.normal(k, shape, jnp.float32)).astype(jnp.bfloat16)

    wq, wk, wv = w(ks[0], (dim, dim)), w(ks[1], (dim, dim)), w(ks[2], (dim, dim))
    return {
        "ln1_g": jnp.ones((1, dim), jnp.float32),
        "ln1_b": jnp.zeros((1, dim), jnp.float32),
        "wqkv": jnp.concatenate([wq, wk, wv], axis=1),   # (dim, 3*dim) bf16
        "wo": w(ks[3], (dim, dim)),
        "ln2_g": jnp.ones((1, dim), jnp.float32),
        "ln2_b": jnp.zeros((1, dim), jnp.float32),
        "w1": w(ks[4], (dim, hidden)),
        "b1": jnp.zeros((1, hidden), jnp.float32),
        "w2": w(ks[5], (hidden, dim)),
        "b2": jnp.zeros((1, dim), jnp.float32),
    }


# ---------------------------------------------------------------------------
# Pure-JAX reference (f32 math on the same bf16 weights) for a sanity check.
# ---------------------------------------------------------------------------
def _reference_forward(x, layers_params):
    def ln(h, g, b):
        mu = jnp.mean(h, -1, keepdims=True)
        var = jnp.mean(jnp.square(h - mu), -1, keepdims=True)
        return (h - mu) * jax.lax.rsqrt(var + 1e-5) * g + b

    D = x.shape[-1]
    for p in layers_params:
        xn = ln(x, p["ln1_g"], p["ln1_b"])
        qkv = xn @ p["wqkv"].astype(jnp.float32)
        q, k, v = qkv[..., :D], qkv[..., D:2 * D], qkv[..., 2 * D:]
        s = jnp.einsum('bqd,bkd->bqk', q, k) / jnp.sqrt(float(D))
        a = jax.nn.softmax(s, axis=-1)
        ctx = jnp.einsum('bqk,bkd->bqd', a, v)
        x = x + ctx @ p["wo"].astype(jnp.float32)
        xn2 = ln(x, p["ln2_g"], p["ln2_b"])
        h = jax.nn.gelu(xn2 @ p["w1"].astype(jnp.float32) + p["b1"])
        x = x + h @ p["w2"].astype(jnp.float32) + p["b2"]
    return x


if __name__ == "__main__":
    # Small but lane-dense shapes: D, H multiples of 128; N multiple of 8.
    B, N, D, H, DEPTH = 2, 16, 128, 256, 3

    root = jax.random.PRNGKey(0)
    kx, *layer_keys = jax.random.split(root, DEPTH + 1)

    x = jax.random.normal(kx, (B, N, D), jnp.float32)
    layers_params = [init_layer_params(k, D, H) for k in layer_keys]

    ref = _reference_forward(x, layers_params)
    out = sequential_sequence_forward(x, layers_params)
    out = jax.block_until_ready(out)

    assert out.shape == (B, N, D) and out.dtype == jnp.float32
    assert bool(jnp.isfinite(out).all())
    err = float(jnp.max(jnp.abs(out - ref)))
    assert bool(jnp.allclose(out, ref, atol=5e-2, rtol=5e-2)), err
    print("KERNEL_OK")
</pallas_src>

<mosaic_0001>
module attributes {stable_mosaic.version = 11 : i64} {
  func.func @_depth_fused_kernel(%arg0: i32, %arg1: i32, %arg2: memref<2x16x128xf32, #tpu.memory_space<any>>, %arg3: memref<1x8x256xf32, #tpu.memory_space<vmem>>, %arg4: memref<1x128x384xbf16, #tpu.memory_space<vmem>>, %arg5: memref<1x128x128xbf16, #tpu.memory_space<vmem>>, %arg6: memref<1x128x256xbf16, #tpu.memory_space<vmem>>, %arg7: memref<1x256x128xbf16, #tpu.memory_space<vmem>>, %arg8: memref<1x16x128xf32, #tpu.memory_space<vmem>>, %arg9: memref<1x!tpu.dma_semaphore, #tpu.memory_space<semaphore_mem>>) attributes {dimension_semantics = [#tpu.dimension_semantics<parallel>, #tpu.dimension_semantics<arbitrary>], iteration_bounds = array<i64: 2, 3>, scalar_prefetch = 0 : i64, scratch_operands = 1 : i64, tpu.core_type = #tpu.core_type<tc>, window_params = [{}, {transform_indices = @transform_1, window_bounds = array<i64: 1, 8, 256>}, {transform_indices = @transform_2, window_bounds = array<i64: 1, 128, 384>}, {transform_indices = @transform_3, window_bounds = array<i64: 1, 128, 128>}, {transform_indices = @transform_4, window_bounds = array<i64: 1, 128, 256>}, {transform_indices = @transform_5, window_bounds = array<i64: 1, 256, 128>}, {transform_indices = @transform_6, window_bounds = array<i64: 1, 16, 128>}]} {
    %c0_i32 = arith.constant 0 : i32
    %0 = arith.cmpi eq, %arg1, %c0_i32 : i32
    %1 = arith.extui %0 : i1 to i32
    %c0_i32_0 = arith.constant 0 : i32
    %2 = arith.cmpi ne, %1, %c0_i32_0 : i32
    scf.if %2 {
      %c0_i32_42 = arith.constant 0 : i32
      %c0_i32_43 = arith.constant 0 : i32
      %c0_i32_44 = arith.constant 0 : i32
      %c0_i32_45 = arith.constant 0 : i32
      %114 = tpu.memref_slice %arg2[%arg0, %c0_i32_44, %c0_i32_45] : memref<2x16x128xf32, #tpu.memory_space<any>> -> memref<1x16x128xf32, #tpu.memory_space<any>>
      %115 = tpu.memref_squeeze %114 : memref<1x16x128xf32, #tpu.memory_space<any>> -> memref<16x128xf32, #tpu.memory_space<any>>
      %c0_i32_46 = arith.constant 0 : i32
      %c0_i32_47 = arith.constant 0 : i32
      %116 = tpu.memref_slice %arg8[%c0_i32_42, %c0_i32_46, %c0_i32_47] : memref<1x16x128xf32, #tpu.memory_space<vmem>> -> memref<1x16x128xf32, #tpu.memory_space<vmem>>
      %117 = tpu.memref_squeeze %116 : memref<1x16x128xf32, #tpu.memory_space<vmem>> -> memref<16x128xf32, #tpu.memory_space<vmem>>
      %118 = tpu.memref_slice %arg9[%c0_i32_43] : memref<1x!tpu.dma_semaphore, #tpu.memory_space<semaphore_mem>> -> memref<1x!tpu.dma_semaphore, #tpu.memory_space<semaphore_mem>>
      %119 = tpu.memref_squeeze %118 : memref<1x!tpu.dma_semaphore, #tpu.memory_space<semaphore_mem>> -> memref<!tpu.dma_semaphore, #tpu.memory_space<semaphore_mem>>
      tpu.enqueue_dma source(%115 : memref<16x128xf32, #tpu.memory_space<any>>) target(%117 : memref<16x128xf32, #tpu.memory_space<vmem>>) target_semaphore(%119 : memref<!tpu.dma_semaphore, #tpu.memory_space<semaphore_mem>>)
      %c0_i32_48 = arith.constant 0 : i32
      %c0_i32_49 = arith.constant 0 : i32
      %c0_i32_50 = arith.constant 0 : i32
      %c0_i32_51 = arith.constant 0 : i32
      %120 = tpu.memref_slice %arg2[%arg0, %c0_i32_50, %c0_i32_51] : memref<2x16x128xf32, #tpu.memory_space<any>> -> memref<1x16x128xf32, #tpu.memory_space<any>>
      %121 = tpu.memref_squeeze %120 : memref<1x16x128xf32, #tpu.memory_space<any>> -> memref<16x128xf32, #tpu.memory_space<any>>
      %c0_i32_52 = arith.constant 0 : i32
      %c0_i32_53 = arith.constant 0 : i32
      %122 = tpu.memref_slice %arg8[%c0_i32_48, %c0_i32_52, %c0_i32_53] : memref<1x16x128xf32, #tpu.memory_space<vmem>> -> memref<1x16x128xf32, #tpu.memory_space<vmem>>
      %123 = tpu.memref_squeeze %122 : memref<1x16x128xf32, #tpu.memory_space<vmem>> -> memref<16x128xf32, #tpu.memory_space<vmem>>
      %124 = tpu.memref_slice %arg9[%c0_i32_49] : memref<1x!tpu.dma_semaphore, #tpu.memory_space<semaphore_mem>> -> memref<1x!tpu.dma_semaphore, #tpu.memory_space<semaphore_mem>>
      %125 = tpu.memref_squeeze %124 : memref<1x!tpu.dma_semaphore, #tpu.memory_space<semaphore_mem>> -> memref<!tpu.dma_semaphore, #tpu.memory_space<semaphore_mem>>
      tpu.wait_dma2 semaphore(%125 : memref<!tpu.dma_semaphore, #tpu.memory_space<semaphore_mem>>) src(%121 : memref<16x128xf32, #tpu.memory_space<any>>) dst(%123 : memref<16x128xf32, #tpu.memory_space<vmem>>)
    } else {
    }
    %c0 = arith.constant 0 : index
    %c0_1 = arith.constant 0 : index
    %c0_2 = arith.constant 0 : index
    %3 = vector.load %arg8[%c0, %c0_1, %c0_2] : memref<1x16x128xf32, #tpu.memory_space<vmem>>, vector<1x16x128xf32>
    %4 = vector.shape_cast %3 : vector<1x16x128xf32> to vector<16x128xf32>
    %c0_3 = arith.constant 0 : index
    %c0_4 = arith.constant 0 : index
    %c0_5 = arith.constant 0 : index
    %5 = vector.load %arg3[%c0_3, %c0_4, %c0_5] : memref<1x8x256xf32, #tpu.memory_space<vmem>>, vector<1x8x256xf32>
    %6 = vector.shape_cast %5 : vector<1x8x256xf32> to vector<8x256xf32>
    %7 = vector.extract_strided_slice %6 {offsets = [0, 0], sizes = [1, 128], strides = [1, 1]} : vector<8x256xf32> to vector<1x128xf32>
    %8 = vector.extract_strided_slice %6 {offsets = [1, 0], sizes = [1, 128], strides = [1, 1]} : vector<8x256xf32> to vector<1x128xf32>
    %9 = vector.extract_strided_slice %6 {offsets = [2, 0], sizes = [1, 128], strides = [1, 1]} : vector<8x256xf32> to vector<1x128xf32>
    %10 = vector.extract_strided_slice %6 {offsets = [3, 0], sizes = [1, 128], strides = [1, 1]} : vector<8x256xf32> to vector<1x128xf32>
    %11 = vector.extract_strided_slice %6 {offsets = [4, 0], sizes = [1, 256], strides = [1, 1]} : vector<8x256xf32> to vector<1x256xf32>
    %12 = vector.extract_strided_slice %6 {offsets = [5, 0], sizes = [1, 128], strides = [1, 1]} : vector<8x256xf32> to vector<1x128xf32>
    %cst = arith.constant dense<0.000000e+00> : vector<16xf32>
    %13 = vector.multi_reduction <add>, %4, %cst [1] : vector<16x128xf32> to vector<16xf32>
    %14 = vector.shape_cast %13 : vector<16xf32> to vector<16x1xf32>
    %cst_6 = arith.constant 1.280000e+02 : f32
    %15 = vector.broadcast %cst_6 : f32 to vector<16x1xf32>
    %16 = arith.divf %14, %15 : vector<16x1xf32>
    %17 = vector.broadcast %16 : vector<16x1xf32> to vector<16x128xf32>
    %18 = arith.subf %4, %17 : vector<16x128xf32>
    %19 = arith.mulf %18, %18 : vector<16x128xf32>
    %cst_7 = arith.constant dense<0.000000e+00> : vector<16xf32>
    %20 = vector.multi_reduction <add>, %19, %cst_7 [1] : vector<16x128xf32> to vector<16xf32>
    %21 = vector.shape_cast %20 : vector<16xf32> to vector<16x1xf32>
    %cst_8 = arith.constant 1.280000e+02 : f32
    %22 = vector.broadcast %cst_8 : f32 to vector<16x1xf32>
    %23 = arith.divf %21, %22 : vector<16x1xf32>
    %24 = vector.broadcast %16 : vector<16x1xf32> to vector<16x128xf32>
    %25 = arith.subf %4, %24 : vector<16x128xf32>
    %cst_9 = arith.constant 9.99999974E-6 : f32
    %26 = vector.broadcast %cst_9 : f32 to vector<16x1xf32>
    %27 = arith.addf %23, %26 : vector<16x1xf32>
    %28 = math.rsqrt %27 : vector<16x1xf32>
    %29 = vector.broadcast %28 : vector<16x1xf32> to vector<16x128xf32>
    %30 = arith.mulf %25, %29 : vector<16x128xf32>
    %31 = vector.broadcast %7 : vector<1x128xf32> to vector<16x128xf32>
    %32 = arith.mulf %30, %31 : vector<16x128xf32>
    %33 = vector.broadcast %8 : vector<1x128xf32> to vector<16x128xf32>
    %34 = arith.addf %32, %33 : vector<16x128xf32>
    %35 = arith.truncf %34 : vector<16x128xf32> to vector<16x128xbf16>
    %c0_10 = arith.constant 0 : index
    %c0_11 = arith.constant 0 : index
    %c0_12 = arith.constant 0 : index
    %36 = vector.load %arg4[%c0_10, %c0_11, %c0_12] : memref<1x128x384xbf16, #tpu.memory_space<vmem>>, vector<1x128x384xbf16>
    %37 = vector.shape_cast %36 : vector<1x128x384xbf16> to vector<128x384xbf16>
    %cst_13 = arith.constant dense<0.000000e+00> : vector<16x384xf32>
    %38 = tpu.matmul %35, %37, %cst_13 {dimension_numbers = #tpu.dot_dimension_numbers<[1], [0], [0], [1], [0, 0, 1, 1], [], []>} : vector<16x128xbf16>, vector<128x384xbf16>, vector<16x384xf32> -> vector<16x384xf32>
    %39 = vector.extract_strided_slice %38 {offsets = [0, 0], sizes = [16, 128], strides = [1, 1]} : vector<16x384xf32> to vector<16x128xf32>
    %40 = arith.truncf %39 : vector<16x128xf32> to vector<16x128xbf16>
    %41 = vector.extract_strided_slice %38 {offsets = [0, 128], sizes = [16, 128], strides = [1, 1]} : vector<16x384xf32> to vector<16x128xf32>
    %42 = arith.truncf %41 : vector<16x128xf32> to vector<16x128xbf16>
    %43 = vector.extract_strided_slice %38 {offsets = [0, 256], sizes = [16, 128], strides = [1, 1]} : vector<16x384xf32> to vector<16x128xf32>
    %44 = arith.truncf %43 : vector<16x128xf32> to vector<16x128xbf16>
    %cst_14 = arith.constant dense<0.000000e+00> : vector<16x16xf32>
    %45 = tpu.matmul %40, %42, %cst_14 {dimension_numbers = #tpu.dot_dimension_numbers<[1], [1], [0], [0], [0, 0, 1, 0], [], []>} : vector<16x128xbf16>, vector<16x128xbf16>, vector<16x16xf32> -> vector<16x16xf32>
    %cst_15 = arith.constant dense<0xFF800000> : vector<16xf32>
    %46 = vector.multi_reduction <maximumf>, %45, %cst_15 [1] : vector<16x16xf32> to vector<16xf32>
    %47 = vector.shape_cast %46 : vector<16xf32> to vector<16x1xf32>
    %48 = vector.broadcast %47 : vector<16x1xf32> to vector<16x16xf32>
    %49 = arith.subf %45, %48 : vector<16x16xf32>
    %50 = math.exp %49 : vector<16x16xf32>
    %cst_16 = arith.constant dense<0.000000e+00> : vector<16xf32>
    %51 = vector.multi_reduction <add>, %50, %cst_16 [1] : vector<16x16xf32> to vector<16xf32>
    %52 = vector.shape_cast %51 : vector<16xf32> to vector<16x1xf32>
    %53 = tpu.reciprocal %52 {approx = true} : vector<16x1xf32> -> vector<16x1xf32>
    %54 = vector.broadcast %53 : vector<16x1xf32> to vector<16x16xf32>
    %55 = arith.mulf %50, %54 : vector<16x16xf32>
    %56 = arith.truncf %55 : vector<16x16xf32> to vector<16x16xbf16>
    %cst_17 = arith.constant dense<0.000000e+00> : vector<16x128xf32>
    %57 = tpu.matmul %56, %44, %cst_17 {dimension_numbers = #tpu.dot_dimension_numbers<[1], [0], [0], [1], [0, 0, 1, 1], [], []>} : vector<16x16xbf16>, vector<16x128xbf16>, vector<16x128xf32> -> vector<16x128xf32>
    %58 = arith.truncf %57 : vector<16x128xf32> to vector<16x128xbf16>
    %c0_18 = arith.constant 0 : index
    %c0_19 = arith.constant 0 : index
    %c0_20 = arith.constant 0 : index
    %59 = vector.load %arg5[%c0_18, %c0_19, %c0_20] : memref<1x128x128xbf16, #tpu.memory_space<vmem>>, vector<1x128x128xbf16>
    %60 = vector.shape_cast %59 : vector<1x128x128xbf16> to vector<128x128xbf16>
    %cst_21 = arith.constant dense<0.000000e+00> : vector<16x128xf32>
    %61 = tpu.matmul %58, %60, %cst_21 {dimension_numbers = #tpu.dot_dimension_numbers<[1], [0], [0], [1], [0, 0, 1, 1], [], []>} : vector<16x128xbf16>, vector<128x128xbf16>, vector<16x128xf32> -> vector<16x128xf32>
    %62 = arith.addf %4, %61 : vector<16x128xf32>
    %cst_22 = arith.constant dense<0.000000e+00> : vector<16xf32>
    %63 = vector.multi_reduction <add>, %62, %cst_22 [1] : vector<16x128xf32> to vector<16xf32>
    %64 = vector.shape_cast %63 : vector<16xf32> to vector<16x1xf32>
    %cst_23 = arith.constant 1.280000e+02 : f32
    %65 = vector.broadcast %cst_23 : f32 to vector<16x1xf32>
    %66 = arith.divf %64, %65 : vector<16x1xf32>
    %67 = vector.broadcast %66 : vector<16x1xf32> to vector<16x128xf32>
    %68 = arith.subf %62, %67 : vector<16x128xf32>
    %69 = arith.mulf %68, %68 : vector<16x128xf32>
    %cst_24 = arith.constant dense<0.000000e+00> : vector<16xf32>
    %70 = vector.multi_reduction <add>, %69, %cst_24 [1] : vector<16x128xf32> to vector<16xf32>
    %71 = vector.shape_cast %70 : vector<16xf32> to vector<16x1xf32>
    %cst_25 = arith.constant 1.280000e+02 : f32
    %72 = vector.broadcast %cst_25 : f32 to vector<16x1xf32>
    %73 = arith.divf %71, %72 : vector<16x1xf32>
    %74 = vector.broadcast %66 : vector<16x1xf32> to vector<16x128xf32>
    %75 = arith.subf %62, %74 : vector<16x128xf32>
    %cst_26 = arith.constant 9.99999974E-6 : f32
    %76 = vector.broadcast %cst_26 : f32 to vector<16x1xf32>
    %77 = arith.addf %73, %76 : vector<16x1xf32>
    %78 = math.rsqrt %77 : vector<16x1xf32>
    %79 = vector.broadcast %78 : vector<16x1xf32> to vector<16x128xf32>
    %80 = arith.mulf %75, %79 : vector<16x128xf32>
    %81 = vector.broadcast %9 : vector<1x128xf32> to vector<16x128xf32>
    %82 = arith.mulf %80, %81 : vector<16x128xf32>
    %83 = vector.broadcast %10 : vector<1x128xf32> to vector<16x128xf32>
    %84 = arith.addf %82, %83 : vector<16x128xf32>
    %85 = arith.truncf %84 : vector<16x128xf32> to vector<16x128xbf16>
    %c0_27 = arith.constant 0 : index
    %c0_28 = arith.constant 0 : index
    %c0_29 = arith.constant 0 : index
    %86 = vector.load %arg6[%c0_27, %c0_28, %c0_29] : memref<1x128x256xbf16, #tpu.memory_space<vmem>>, vector<1x128x256xbf16>
    %87 = vector.shape_cast %86 : vector<1x128x256xbf16> to vector<128x256xbf16>
    %cst_30 = arith.constant dense<0.000000e+00> : vector<16x256xf32>
    %88 = tpu.matmul %85, %87, %cst_30 {dimension_numbers = #tpu.dot_dimension_numbers<[1], [0], [0], [1], [0, 0, 1, 1], [], []>} : vector<16x128xbf16>, vector<128x256xbf16>, vector<16x256xf32> -> vector<16x256xf32>
    %89 = vector.broadcast %11 : vector<1x256xf32> to vector<16x256xf32>
    %90 = arith.addf %88, %89 : vector<16x256xf32>
    %91 = arith.mulf %90, %90 : vector<16x256xf32>
    %92 = arith.mulf %90, %91 : vector<16x256xf32>
    %cst_31 = arith.constant 4.471500e-02 : f32
    %93 = vector.broadcast %cst_31 : f32 to vector<16x256xf32>
    %94 = arith.mulf %93, %92 : vector<16x256xf32>
    %95 = arith.addf %90, %94 : vector<16x256xf32>
    %cst_32 = arith.constant 0.797884583 : f32
    %96 = vector.broadcast %cst_32 : f32 to vector<16x256xf32>
    %97 = arith.mulf %96, %95 : vector<16x256xf32>
    %98 = math.tanh %97 : vector<16x256xf32>
    %cst_33 = arith.constant 1.000000e+00 : f32
    %99 = vector.broadcast %cst_33 : f32 to vector<16x256xf32>
    %100 = arith.addf %99, %98 : vector<16x256xf32>
    %cst_34 = arith.constant 5.000000e-01 : f32
    %101 = vector.broadcast %cst_34 : f32 to vector<16x256xf32>
    %102 = arith.mulf %101, %100 : vector<16x256xf32>
    %103 = arith.mulf %90, %102 : vector<16x256xf32>
    %104 = arith.truncf %103 : vector<16x256xf32> to vector<16x256xbf16>
    %c0_35 = arith.constant 0 : index
    %c0_36 = arith.constant 0 : index
    %c0_37 = arith.constant 0 : index
    %105 = vector.load %arg7[%c0_35, %c0_36, %c0_37] : memref<1x256x128xbf16, #tpu.memory_space<vmem>>, vector<1x256x128xbf16>
    %106 = vector.shape_cast %105 : vector<1x256x128xbf16> to vector<256x128xbf16>
    %cst_38 = arith.constant dense<0.000000e+00> : vector<16x128xf32>
    %107 = tpu.matmul %104, %106, %cst_38 {dimension_numbers = #tpu.dot_dimension_numbers<[1], [0], [0], [1], [0, 0, 1, 1], [], []>} : vector<16x256xbf16>, vector<256x128xbf16>, vector<16x128xf32> -> vector<16x128xf32>
    %108 = vector.broadcast %12 : vector<1x128xf32> to vector<16x128xf32>
    %109 = arith.addf %107, %108 : vector<16x128xf32>
    %110 = arith.addf %62, %109 : vector<16x128xf32>
    %c0_39 = arith.constant 0 : index
    %c0_40 = arith.constant 0 : index
    %c0_41 = arith.constant 0 : index
    %111 = vector.load %arg8[%c0_39, %c0_40, %c0_41] : memref<1x16x128xf32, #tpu.memory_space<vmem>>, vector<1x16x128xf32>
    %112 = vector.shape_cast %111 : vector<1x16x128xf32> to vector<16x128xf32>
    %113 = vector.shape_cast %110 : vector<16x128xf32> to vector<1x16x128xf32>
    tpu.vector_store %arg8[%c0_39, %c0_40, %c0_41], %113 {strides = array<i32>} : memref<1x16x128xf32, #tpu.memory_space<vmem>>, vector<1x16x128xf32>,
    return
  }
  func.func @transform_1(%arg0: i32, %arg1: i32) -> (i32, i32, i32) {
    %c0_i32 = arith.constant 0 : i32
    %c0_i32_0 = arith.constant 0 : i32
    %c0_i32_1 = arith.constant 0 : i32
    return %arg1, %c0_i32, %c0_i32_0 : i32, i32, i32
  }
  func.func @transform_2(%arg0: i32, %arg1: i32) -> (i32, i32, i32) {
    %c0_i32 = arith.constant 0 : i32
    %c0_i32_0 = arith.constant 0 : i32
    %c0_i32_1 = arith.constant 0 : i32
    return %arg1, %c0_i32, %c0_i32_0 : i32, i32, i32
  }
  func.func @transform_3(%arg0: i32, %arg1: i32) -> (i32, i32, i32) {
    %c0_i32 = arith.constant 0 : i32
    %c0_i32_0 = arith.constant 0 : i32
    %c0_i32_1 = arith.constant 0 : i32
    return %arg1, %c0_i32, %c0_i32_0 : i32, i32, i32
  }
  func.func @transform_4(%arg0: i32, %arg1: i32) -> (i32, i32, i32) {
    %c0_i32 = arith.constant 0 : i32
    %c0_i32_0 = arith.constant 0 : i32
    %c0_i32_1 = arith.constant 0 : i32
    return %arg1, %c0_i32, %c0_i32_0 : i32, i32, i32
  }
  func.func @transform_5(%arg0: i32, %arg1: i32) -> (i32, i32, i32) {
    %c0_i32 = arith.constant 0 : i32
    %c0_i32_0 = arith.constant 0 : i32
    %c0_i32_1 = arith.constant 0 : i32
    return %arg1, %c0_i32, %c0_i32_0 : i32, i32, i32
  }
  func.func @transform_6(%arg0: i32, %arg1: i32) -> (i32, i32, i32) {
    %c0_i32 = arith.constant 0 : i32
    %c0_i32_0 = arith.constant 0 : i32
    %c0_i32_1 = arith.constant 0 : i32
    return %arg0, %c0_i32, %c0_i32_0 : i32, i32, i32
  }
}

</mosaic_0001>

<bundles_post_ra>
// kernel: tpu_custom_call.1
= control target key start
LH: loop header
LB: loop body
LE: loop exit
PB: predicated region body
PF: predicated region fallthrough
CT: control target
= control target key end

     0   :  { %s2818_s0 = inlined_call_operand.hbm [shape: f32[2,16,128], index: 0, kind: input, shape index: {}]   ;;  %s2819_s1 = inlined_call_operand.hbm [shape: f32[3,8,256], index: 1, kind: input, shape index: {}]   ;;  %s2820_s2 = inlined_call_operand.hbm [shape: bf16[3,128,384], index: 2, kind: input, shape index: {}]   ;;  %s2821_s3 = inlined_call_operand.hbm [shape: bf16[3,128,128], index: 3, kind: input, shape index: {}]   ;;  %s2822_s4 = inlined_call_operand.hbm [shape: bf16[3,128,256], index: 4, kind: input, shape index: {}]   ;;  %s2823_s5 = inlined_call_operand.hbm [shape: bf16[3,256,128], index: 5, kind: input, shape index: {}]   ;;  %s2824_s6 = inlined_call_operand.hbm [shape: f32[2,16,128], index: 6, kind: output, shape index: {}]  }
   0x1   :  { %2844 = sst [smem:[#allocation37_spill]] %s2818_s0 }
   0x2   :  { %2845 = sst [smem:[#allocation38_spill]] %s2820_s2 }
   0x3   :  { %2846 = sst [smem:[#allocation39_spill]] %s2822_s4 }
   0x4   :  { %2847 = sst [smem:[#allocation40_spill]] %s2824_s6 }
   0x5   :  { %11 = vsyncpa [#allocation4], 0 }
   0x6   :  { %13 = vsyncpa [#allocation4 + $0x1], 0 }
   0x7   :  { %14 = vsyncpa [#allocation7], 0 }
   0x8   :  { %16 = vsyncpa [#allocation7 + $0x1], 0 }
   0x9   :  { %17 = vsyncpa [#allocation10], 0 }
   0xa   :  { %19 = vsyncpa [#allocation10 + $0x1], 0 }
   0xb   :  { %20 = vsyncpa [#allocation5], 0 }
   0xc   :  { %22 = vsyncpa [#allocation5 + $0x1], 0  ;;  %s2318_s21 = smov 0   ;;  %s2320_s22 = smov 0  }
   0xd   :  { %s2322_s23 = smov 0   ;;  %s2324_s24 = smov 0  }
   0xe   :  { %s2326_s25 = smov 0   ;;  %s2328_s26 = smov 0  }
   0xf   :  { %s2330_s27 = smov 0   ;;  %s2332_s28 = smov 0  }
  0x10   :  { %s2334_s29 = smov 0   ;;  %s2336_s30 = smov 0  }
  0x11   :  { %s2338_s7 = smov 0  }
  0x12 LB: > { %2848 = sst [smem:[#allocation22_spill]] %s2224_s21  ;;  %s2372_s8 = sadd.s32 4294967295, %s2264_s7   ;;  %s2264_s7 = sphi %s2338_s7, %s28_s7   ;;  %s2260_s30 = sphi %s2336_s30, %s2894_s30   ;;  %s2256_s29 = sphi %s2334_s29, %s2898_s29   ;;  %s2252_s28 = sphi %s2332_s28, %s2892_s28   ;;  %s2248_s27 = sphi %s2330_s27, %s2897_s27   ;;  %s2244_s26 = sphi %s2328_s26, %s2891_s26   ;;  %s2240_s25 = sphi %s2326_s25, %s2896_s25   ;;  %s2236_s24 = sphi %s2324_s24, %s2895_s24   ;;  %s2232_s23 = sphi %s2322_s23, %s2889_s23   ;;  %s2228_s22 = sphi %s2320_s22, %s2888_s22   ;;  %s2224_s21 = sphi %s2318_s21, %s2887_s21  }
  0x13   : > { %2849 = sst [smem:[#allocation23_spill]] %s2228_s22  ;;  %s1524_s9 = sadd.s32 4294967294, %s2264_s7  }
  0x14   : > { %2850 = sst [smem:[#allocation24_spill]] %s2232_s23  ;;  %s37_s10 = sadd.s32 1, %s2256_s29 }
  0x15   : > { %2851 = sst [smem:[#allocation25_spill]] %s2244_s26  ;;  %s40_s11 = sadd.s32 1, %s2260_s30 }
  0x16   : > { %2852 = sst [smem:[#allocation26_spill]] %s2248_s27  ;;  %p38_p0 = scmp.ge.s32.totalorder %s37_s10, 3 }
  0x17   : > { %2853 = sst [smem:[#allocation27_spill]] %s2252_s28  ;;  %s47_s12 = sadd.s32 1, %s2244_s26 }
  0x18   : > { %2854 = sst [smem:[#allocation28_spill]] %s2260_s30  ;;  %p54_p1 = scmp.ne.s32.totalorder %s2244_s26, %s2240_s25 }
  0x19   : > { %2855 = sst [smem:[#allocation29_spill]] %s2264_s7  ;;  %p55_p2 = scmp.eq.s32.totalorder %s2264_s7, 0 }
  0x1a   : > { %2856 = sst [smem:[#allocation30_spill]] %s2372_s8  ;;  %s2900_s10 = smov (%p38_p0, %s37_s10), 0 }
  0x1b   : > { %2857 = sst [smem:[#allocation31_spill]] %s2900_s10  ;;  %s2902_s11 = smov (!%p38_p0, %s40_s11), %s2260_s30 }
  0x1c   : > { %s44_s13 = ssub.s32 %s2256_s29, %s2900_s10  ;;  %p2386_p3 = por %p55_p2, %p54_p1 }
  0x1d   : > { %p42_p4 = scmp.ge.s32.totalorder %s2902_s11, 2  ;;  %p45_p5 = scmp.eq.s32.totalorder %s44_s13, 0 }
  0x1e   : > { %p60_p6 = scmp.ne.s32.totalorder %s2240_s25, %s2236_s24  ;;  %p61_p7 = scmp.eq.s32.totalorder %s2372_s8, 0 }
  0x1f   : > { %s2904_s11 = smov (%p42_p4, %s2902_s11), 0  ;;  %s177_s18 = sadd.s32 1, %s2232_s23 }
  0x20   : > { %2859 = sst [smem:[#allocation32_spill]] %s2904_s11  ;;  %p2397_p8 = por %p61_p7, %p60_p6 }
  0x21   : > { %s2395_s15 = scalar_select %p45_p5, %s2244_s26, %s47_s12  }
  0x22   : > { %s174_s17 = ssub.s32 %s2260_s30, %s2904_s11  ;;  %p187_p10 = scmp.ne.s32.totalorder %s2232_s23, %s2228_s22 }
  0x23   : > { %2860 = sst [smem:[#allocation33_spill]] %s2395_s15  ;;  %p175_p9 = scmp.eq.s32.totalorder %s174_s17, 0 }
  0x24   : > { %p188_p11 = scmp.eq.s32.totalorder %s2372_s8, 5  ;;  %p193_p13 = scmp.ne.s32.totalorder %s2228_s22, %s2224_s21 }
  0x25   : > { %s2408_s19 = scalar_select %p175_p9, %s2232_s23, %s177_s18  }
  0x26   : > { %p2410_p12 = por %p188_p11, %p187_p10  ;;  %p194_p0 = scmp.eq.s32.totalorder %s1524_s9, 5 }
  0x27   : > { %2862 = sst [smem:[#allocation34_spill]] %s2408_s19  ;;  %p1760_p1 = scmp.lt.s32.totalorder %s2264_s7, 6 }
  0x28   : > { %s2863_s20 = scalar_select %p2410_p12, 1, 0 }
  0x29   : > { %s2418_s24 = sand.u32 1, %s2244_s26   ;;  %p2420_p2 = por %p194_p0, %p193_p13 }
  0x2a   : > { %2864 = sst [smem:[#allocation35_spill]] %s2863_s20  ;;  %s2830_s13 = sand.u32 1, %s2264_s7  }
  0x2b   : > { %s2865_s12 = scalar_select %p2420_p2, 1, 0 }
  0x2c   : > { %p2427_p4 = pnand %p1760_p1, %p2386_p3  ;;  %s1722_s18 = smul.u32 192, %s2418_s24 }
  0x2d   : > { %2866 = sst [smem:[#allocation36_spill]] %s2865_s12  ;;  %s1723_s11 = smul.u32 3072, %s2256_s29 }
  0x2e   : > { %s2868_s2 = sld [smem:[#allocation38_spill]]  ;;  %s237_s15 = scalar_lea.vmem [#allocation6], %s1722_s18 }
  0x2f   : > { %s244_s26 = sshll.u32 %s237_s15, 4  ;;  %p1540_p5 = scmp.ge.s32.totalorder %s2264_s7, 1  ;;  %s245_s26 = int_to_ptr.vmem [resolvable:$true] %s244_s26 }
  0x30   : > { %s2439_s19 = scalar_lea.sflag [#allocation7], %s2830_s13  ;;  %p2443_p6 = pneg %p2427_p4 }
  0x31   : > { %s1979_s23 = scalar_lea.vmem %s245_s26, 3072  ;;  %s2266_s30 = smov [#allocation6]  }
  0x32   : > { %p1980_p3 = scmp.ne.s32.totalorder %s245_s26, %s1979_s23  ;;  %s1984_s10 = sshll.u32 %s2266_s30, 4  ;;  %s1985_s10 = int_to_ptr.vmem [resolvable:$false] %s1984_s10 }
  0x33   : > { %p1987_p10 = scmp.lt.s32.totalorder %s245_s26, %s1985_s10 }
  0x34   : > { %s243_s9 = scalar_lea.hbm %s2868_s2, %s1723_s11  ;;  %p1982_p7 = pnand %p1980_p3, %p2443_p6 }
  0x35   : > { %s1986_s11 = scalar_lea.vmem %s1985_s10, 6144 }
  0x36   : > { %p1983_p9 = pneg %p1982_p7  ;;  %p1988_p11 = scmp.lt.s32.totalorder %s1986_s11, %s1979_s23 }
  0x38   : > { %p1989_p13 = por %p1988_p11, %p1987_p10 }
  0x3a   : > { %p1990_p0 = pnand %p1989_p13, %p1983_p9 }
  0x3c   : > { %1993 = shalt.err (!%p1990_p0)
}
  0x3d   : > { %s2267_s15 = smov 192   ;;  %s2268_s18 = smov 12  }
  0x3e   : > { %1746 = dma.hbm_to_vmem [thread:$0]  (!%p2427_p4), %s243_s9, 3072, %s245_s26, %s2439_s19, %s2267_s15, %s2267_s15, %s2268_s18  }
  0x3f   : > { %p315_p1 = scmp.lt.s32.totalorder %s2264_s7, 7  ;;  %s1534_s30 = sshll.u32 %s2418_s24, 7 }
  0x40   : > { %s1622_s13 = sshll.u32 %s2256_s29, 11  ;;  %s2871_s4 = sld [smem:[#allocation39_spill]] }
  0x41   : > { %p2457_p3 = pnand %p1540_p5, %p315_p1  ;;  %s279_s12 = scalar_lea.vmem [#allocation9], %s1534_s30 }
  0x42   : > { %s286_s21 = sshll.u32 %s279_s12, 4  ;;  %s2872_s6 = sand.u32 1, %s2264_s7   ;;  %s287_s21 = int_to_ptr.vmem [resolvable:$true] %s286_s21 }
  0x43   : > { %s2466_s20 = scalar_lea.sflag [#allocation10], %s2872_s6  ;;  %s2007_s0 = scalar_lea.vmem %s287_s21, 2048 }
  0x44   : > { %p2008_p7 = scmp.ne.s32.totalorder %s287_s21, %s2007_s0  ;;  %s2269_s26 = smov [#allocation9]  }
  0x45   : > { %s2012_s9 = sshll.u32 %s2269_s26, 4  ;;  %s2013_s9 = int_to_ptr.vmem [resolvable:$false] %s2012_s9 }
  0x46   : > { %s285_s2 = scalar_lea.hbm %s2871_s4, %s1622_s13  ;;  %p2010_p9 = pnand %p2008_p7, %p2443_p6 }
  0x47   : > { %s2014_s15 = scalar_lea.vmem %s2013_s9, 4096  ;;  %p2015_p5 = scmp.lt.s32.totalorder %s287_s21, %s2013_s9 }
  0x48   : > { %p2011_p10 = pneg %p2010_p9  ;;  %p2016_p11 = scmp.lt.s32.totalorder %s2014_s15, %s2007_s0 }
  0x4a   : > { %p2017_p13 = por %p2016_p11, %p2015_p5 }
  0x4c   : > { %p2018_p0 = pnand %p2017_p13, %p2011_p10 }
  0x4e   : > { %2021 = shalt.err (!%p2018_p0)
}
  0x4f   : > { %s2270_s18 = smov 128   ;;  %s2271_s6 = smov 8  }
  0x50   : > { %1752 = dma.hbm_to_vmem [thread:$0]  (!%p2427_p4), %s285_s2, 2048, %s287_s21, %s2466_s20, %s2270_s18, %s2270_s18, %s2271_s6  }
  0x51   : > { %s2476_s11 = scalar_lea.hbm %s2823_s5, %s1622_s13  ;;  %s300_s0 = scalar_lea.vmem [#allocation11], %s1534_s30 }
  0x52   : > { %s307_s26 = sshll.u32 %s300_s0, 4  ;;  %s1527_s9 = sshll.u32 %s2418_s24, 4  ;;  %s2478_s26 = int_to_ptr.vmem [resolvable:$true] %s307_s26 }
  0x53   : > { %s1620_s15 = sshll.u32 %s2256_s29, 8  ;;  %s218_s27 = scalar_lea.vmem [#allocation3], %s1527_s9 }
  0x54   : > { %s224_s28 = scalar_lea.hbm %s2819_s1, %s1620_s15  ;;  %s226_s22 = sshll.u32 %s218_s27, 4  ;;  %s227_s22 = int_to_ptr.vmem [resolvable:$true] %s226_s22 }
  0x55   : > { %s1531_s8 = sshll.u32 %s2418_s24, 6  ;;  %s215_s2 = scalar_lea.sflag [#allocation4], %s2418_s24 }
  0x56   : > { %s2035_s21 = scalar_lea.vmem %s227_s22, 256  ;;  %s2272_s13 = smov [#allocation3]  }
  0x57   : > { %p2036_p1 = scmp.ne.s32.totalorder %s227_s22, %s2035_s21  ;;  %s2040_s30 = sshll.u32 %s2272_s13, 4  ;;  %s2041_s30 = int_to_ptr.vmem [resolvable:$false] %s2040_s30 }
  0x58   : > { %s2042_s18 = scalar_lea.vmem %s2041_s30, 512  ;;  %p2043_p10 = scmp.lt.s32.totalorder %s227_s22, %s2041_s30 }
  0x59   : > { %p2038_p7 = pnand %p2036_p1, %p2443_p6  ;;  %p2044_p5 = scmp.lt.s32.totalorder %s2042_s18, %s2035_s21 }
  0x5b   : > { %p2039_p9 = pneg %p2038_p7  ;;  %p2045_p11 = por %p2044_p5, %p2043_p10 }
  0x5d   : > { %p2046_p13 = pnand %p2045_p11, %p2039_p9 }
  0x5f   : > { %2049 = shalt.err (!%p2046_p13)
}
  0x60   : > { %1743 = dma.hbm_to_vmem [thread:$0]  (!%p2427_p4), %s224_s28, 256, %s227_s22, %s215_s2  }
  0x61   : > { %s1621_s4 = sshll.u32 %s2256_s29, 10  ;;  %s258_s27 = scalar_lea.vmem [#allocation8], %s1531_s8 }
  0x62   : > { %s265_s7 = sshll.u32 %s258_s27, 4  ;;  %s264_s12 = scalar_lea.hbm %s2821_s3, %s1621_s4  ;;  %s266_s7 = int_to_ptr.vmem [resolvable:$true] %s265_s7 }
  0x63   : > { %s2063_s10 = scalar_lea.vmem %s266_s7, 1024  ;;  %s2273_s0 = smov [#allocation8]  }
  0x64   : > { %p2064_p0 = scmp.ne.s32.totalorder %s266_s7, %s2063_s10  ;;  %s2068_s9 = sshll.u32 %s2273_s0, 4  ;;  %s2069_s9 = int_to_ptr.vmem [resolvable:$false] %s2068_s9 }
  0x65   : > { %s2070_s15 = scalar_lea.vmem %s2069_s9, 2048  ;;  %p2071_p9 = scmp.lt.s32.totalorder %s266_s7, %s2069_s9 }
  0x66   : > { %p2066_p1 = pnand %p2064_p0, %p2443_p6  ;;  %p2072_p10 = scmp.lt.s32.totalorder %s2070_s15, %s2063_s10 }
  0x68   : > { %p2067_p7 = pneg %p2066_p1  ;;  %p2073_p5 = por %p2072_p10, %p2071_p9 }
  0x6a   : > { %p2074_p11 = pnand %p2073_p5, %p2067_p7 }
  0x6c   : > { %2077 = shalt.err (!%p2074_p11)
}
  0x6d   : > { %s2274_s22 = smov 64   ;;  %s2275_s28 = smov 4  }
  0x6e   : > { %1749 = dma.hbm_to_vmem [thread:$0]  (!%p2427_p4), %s264_s12, 1024, %s266_s7, %s2439_s19, %s2274_s22, %s2274_s22, %s2275_s28  }
  0x6f   : > { %s2091_s8 = scalar_lea.vmem %s2478_s26, 2048  ;;  %s2276_s2 = smov [#allocation11]  }
  0x70   : > { %p2092_p13 = scmp.ne.s32.totalorder %s2478_s26, %s2091_s8  ;;  %s2096_s21 = sshll.u32 %s2276_s2, 4  ;;  %s2097_s21 = int_to_ptr.vmem [resolvable:$false] %s2096_s21 }
  0x71   : > { %s2098_s13 = scalar_lea.vmem %s2097_s21, 4096  ;;  %p2099_p7 = scmp.lt.s32.totalorder %s2478_s26, %s2097_s21 }
  0x72   : > { %p2094_p0 = pnand %p2092_p13, %p2443_p6  ;;  %p2100_p9 = scmp.lt.s32.totalorder %s2098_s13, %s2091_s8 }
  0x74   : > { %p2095_p1 = pneg %p2094_p0  ;;  %p2101_p10 = por %p2100_p9, %p2099_p7 }
  0x76   : > { %p2102_p5 = pnand %p2101_p10, %p2095_p1 }
  0x78   : > { %2105 = shalt.err (!%p2102_p5)
}
  0x79   : > { %1755 = dma.hbm_to_vmem [thread:$0]  (!%p2427_p4), %s2476_s11, 2048, %s2478_s26, %s2466_s20, %s2274_s22, %s2274_s22, %s2275_s28  }
  0x7a   : > { %319 = sbr.rel (%p2457_p3) target bundleno = 2365 (0x93d), region = 40  ;;  %s2513_s19 = sand.u32 (!%p2457_p3), 1, %s2240_s25  }
  0x7b   : > { %s1541_s14 = sshll.u32 (!%p2457_p3), %s2513_s19, 4  ;;  %s322_s30 = scalar_lea.sflag (!%p2457_p3), [#allocation4], %s2513_s19 }
  0x7c   : > { %s2517_s18 = scalar_lea.vmem (!%p2457_p3), [#allocation3], %s1541_s14 }
  0x7f   : > { %2203 = dma.done.wait (%p2397_p8), %s322_s30, 256  }
  0x80   : > { %2205 = vsyncadd (%p2397_p8), %s322_s30, 4294967040  ;;  %s2873_s17 = sld [smem:[#allocation30_spill]]  ;;  %s1724_s23 = smul.u32 192, %s2513_s19 }
  0x82   : > { %s2525_s26 = scalar_lea.vmem [#allocation6], %s1724_s23 }
  0x86   : > { %s330_s20 = sand.u32 1, %s2873_s17  }
  0x87   : > { %s331_s11 = scalar_lea.sflag [#allocation7], %s330_s20 }
  0x88   : > { %2207 = dma.done.wait (%p2397_p8), %s331_s11, 4096  }
  0x89   : > { %2209 = vsyncadd (%p2397_p8), %s331_s11, 4294963200  ;;  %s1542_s4 = sshll.u32 %s2513_s19, 6  ;;  %s1543_s27 = sshll.u32 %s2513_s19, 7 }
  0x8a   : > { %s2533_s7 = scalar_lea.vmem [#allocation8], %s1542_s4  ;;  %s349_s24 = scalar_lea.sflag [#allocation10], %s330_s20 }
  0x8b   : > { %s2537_s6 = scalar_lea.vmem [#allocation9], %s1543_s27 }
  0x8c   : > { %2211 = dma.done.wait (%p2397_p8), %s349_s24, 4096  }
  0x8d   : > { %2213 = vsyncadd (%p2397_p8), %s349_s24, 4294963200  ;;  %s2874_s12 = sld [smem:[#allocation23_spill]] }
  0x8e   : > { %s2875_s10 = sld [smem:[#allocation26_spill]] }
  0x8f   : > { %s2876_s0 = sld [smem:[#allocation27_spill]] }
  0x90   : > { %s2877_s16 = sld [smem:[#allocation37_spill]] }
  0x93   : > { %s405_s9 = sand.u32 1, %s2874_s12  }
  0x94   : > { %s1545_s15 = sshll.u32 %s405_s9, 4  ;;  %p1761_p4 = scmp.eq.s32.totalorder %s2875_s10, 0 }
  0x95   : > { %s1624_s22 = sshll.u32 %s2876_s0, 8  ;;  %s2548_s28 = scalar_lea.vmem [#allocation12], %s1545_s15 }
  0x96   : > { %s423_s8 = sshll.u32 %s2548_s28, 4  ;;  %s415_s13 = scalar_lea.hbm %s2877_s16, %s1624_s22  ;;  %s2556_s8 = int_to_ptr.vmem [resolvable:$true] %s423_s8 }
  0x97   : > { %s2106_s14 = scalar_lea.hbm %s415_s13, 256  ;;  %s2110_s20 = scalar_lea.hbm %s2877_s16, 512 }
  0x98   : > { %p2107_p8 = scmp.ne.s32.totalorder %s415_s13, %s2106_s14  ;;  %p2111_p11 = scmp.lt.s32.totalorder %s415_s13, %s2877_s16 }
  0x99   : > { %p2112_p13 = scmp.lt.s32.totalorder %s2110_s20, %s2106_s14 }
  0x9a   : > { %p2108_p6 = pnand %p2107_p8, %p1761_p4 }
  0x9b   : > { %p2113_p0 = por %p2112_p13, %p2111_p11 }
  0x9c   : > { %p2109_p3 = pneg %p2108_p6 }
  0x9e   : > { %p2114_p1 = pnand %p2113_p0, %p2109_p3 }
  0xa0   : > { %2117 = shalt.err (!%p2114_p1)  }
  0xa1   : > { %s2118_s4 = scalar_lea.vmem %s2556_s8, 256  ;;  %s2277_s15 = smov [#allocation12]  }
  0xa2   : > { %p2568_p7 = scmp.ne.s32.totalorder %s2556_s8, %s2118_s4  ;;  %s2122_s2 = sshll.u32 %s2277_s15, 4  ;;  %s2123_s2 = int_to_ptr.vmem [resolvable:$false] %s2122_s2 }
  0xa3   : > { %s2124_s21 = scalar_lea.vmem %s2123_s2, 512  ;;  %p2577_p5 = scmp.lt.s32.totalorder %s2556_s8, %s2123_s2 }
  0xa4   : > { %p2120_p9 = pnand %p2568_p7, %p1761_p4  ;;  %p2581_p8 = scmp.lt.s32.totalorder %s2124_s21, %s2118_s4 }
  0xa6   : > { %p2121_p10 = pneg %p2120_p9  ;;  %p2127_p6 = por %p2581_p8, %p2577_p5 }
  0xa8   : > { %p2128_p3 = pnand %p2127_p6, %p2121_p10 }
  0xaa   : > { %2131 = shalt.err (!%p2128_p3)  }
  0xab   : > { %1736 = dma.hbm_to_vmem [thread:$0]  (%p1761_p4), %s415_s13, 256, %s2556_s8, [#allocation2] }
  0xac   : > { %s2599_s17 = scalar_lea.vmem [#allocation11], %s1543_s27 }
  0xad   : > { %2215 = dma.done.wait (%p1761_p4), [#allocation2], 256 }
  0xae   : > { %2217 = vsyncadd (%p1761_p4), [#allocation2], 4294967040  ;;  %v2606_v0 = vld [vmem:[%s2548_s28] sm:$0xff]  ;;  %v2609_v1 = vld [vmem:[%s2548_s28 + $0x8] sm:$0xff]  ;;  %v2278_v4 = vmov 0.0   ;;  %v2279_v27 = vmov 0   ;;  %v457_v42 = vlaneseq  ;;  %p2134_p4 = pnand %p2568_p7, %p2410_p12 }
  0xaf   : > { %434 = vadd.xlane.f32.xlu0 %v2606_v0  ;;  %v1862_v2 = vld [vmem:[%s2525_s26 + $0xac] ss:$12 sps:$4 sm:$0xff]   ;;  %v1864_v3 = vld [vmem:[%s2525_s26 + $0xa8] ss:$12 sps:$4 sm:$0xff]   ;;  %1670 = vmatprep.subr.bf16.mxu1 %v2278_v4  ;;  %v1865_v5 = vld [vmem:[%s2525_s26 + $0xb0] ss:$12 sps:$4 sm:$0xff]  }
  0xb0   : > { %630 = vmatprep.subr.bf16.mxu0 %v1862_v2  ;;  %1671 = vmatpush3.bf16.msra.mxu1 %v1865_v5  ;;  %v1866_v14 = vld [vmem:[%s2525_s26 + $0x94] ss:$12 sps:$4 sm:$0xff]   ;;  %v1868_v15 = vld [vmem:[%s2525_s26 + $0x90] ss:$12 sps:$4 sm:$0xff]   ;;  %v1869_v16 = vld [vmem:[%s2525_s26 + $0x98] ss:$12 sps:$4 sm:$0xff]   ;;  %p2135_p11 = pneg %p2134_p4 }
  0xb1   : > { %631 = vmatpush1.bf16.msra.mxu0 %v1864_v3  ;;  %1672 = vmatprep.subr.bf16.mxu1 %v2278_v4  ;;  %v1870_v17 = vld [vmem:[%s2525_s26 + $0x7c] ss:$12 sps:$4 sm:$0xff]   ;;  %v1872_v18 = vld [vmem:[%s2525_s26 + $0x78] ss:$12 sps:$4 sm:$0xff]   ;;  %v1873_v19 = vld [vmem:[%s2525_s26 + $0x80] ss:$12 sps:$4 sm:$0xff]  }
  0xb2   : > { %632 = vmatprep.subr.bf16.mxu0 %v1866_v14  ;;  %v1874_v20 = vld [vmem:[%s2525_s26 + $0x64] ss:$12 sps:$4 sm:$0xff]   ;;  %v1876_v21 = vld [vmem:[%s2525_s26 + $0x60] ss:$12 sps:$4 sm:$0xff]   ;;  %v1877_v22 = vld [vmem:[%s2525_s26 + $0x68] ss:$12 sps:$4 sm:$0xff]   ;;  %662 = vmatprep.mubr.bf16.mxu0 %v2279_v27  ;;  %p2142_p13 = pnand %p2135_p11, %p2127_p6 }
  0xb3   : > { %436 = vadd.xlane.f32.xlu0 %v2609_v1  ;;  %v1878_v23 = vld [vmem:[%s2525_s26 + $0x4c] ss:$12 sps:$4 sm:$0xff]   ;;  %v1880_v24 = vld [vmem:[%s2525_s26 + $0x48] ss:$12 sps:$4 sm:$0xff]   ;;  %v1881_v25 = vld [vmem:[%s2525_s26 + $0x50] ss:$12 sps:$4 sm:$0xff]  }
  0xb4   : > { %1673 = vmatpush3.bf16.msra.mxu1 %v1869_v16  ;;  %v1882_v26 = vld [vmem:[%s2525_s26 + $0x34] ss:$12 sps:$4 sm:$0xff]   ;;  %vm2280_vm0 = vmmov 0   ;;  %v1884_v28 = vld [vmem:[%s2525_s26 + $0x30] ss:$12 sps:$4 sm:$0xff]   ;;  %v2660_v43 = vshrl.u32 %v457_v42, 7 }
  0xb5   : > { %633 = vmatpush1.bf16.msra.mxu0 %v1868_v15  ;;  %1674 = vmatprep.subr.bf16.mxu1 %v2278_v4  ;;  %v1885_v29 = vld [vmem:[%s2525_s26 + $0x38] ss:$12 sps:$4 sm:$0xff]   ;;  %v1886_v30 = vld [vmem:[%s2525_s26 + $0x1c] ss:$12 sps:$4 sm:$0xff]   ;;  %v1889_v32 = vld [vmem:[%s2525_s26 + $0x20] ss:$12 sps:$4 sm:$0xff]  }
  0xb6   : > { %634 = vmatprep.subr.bf16.mxu0 %v1870_v17  ;;  %1686 = vmatprep.mubr.msk.bf16.mxu1 %vm2280_vm0, %v2278_v4  ;;  %v1888_v31 = vld [vmem:[%s2525_s26 + $0x18] ss:$12 sps:$4 sm:$0xff]   ;;  %v1892_v34 = vld [vmem:[%s2525_s26] ss:$12 sps:$4 sm:$0xff]   ;;  %v1893_v35 = vld [vmem:[%s2525_s26 + $0x8] ss:$12 sps:$4 sm:$0xff]  }
  0xb7   : > { %v1890_v33 = vld [vmem:[%s2525_s26 + $0x4] ss:$12 sps:$4 sm:$0xff]   ;;  %v459_v44 = vsub.s32 0, %v2660_v43  ;;  %v465_v49 = vsub.s32 1, %v2660_v43  ;;  %vm758_vm1 = vcmask 130048   ;;  %s2882_s27 = sld [smem:[#allocation40_spill]] }
  0xb8   : > { %1675 = vmatpush3.bf16.msra.mxu1 %v1873_v19  ;;  %v2664_v45 = vld [vmem:[%s2517_s18] sm:$0xff]  ;;  %s1332_s10 = scalar_lea.sflag [#allocation5], %s405_s9 }
  0xb9   : > { %635 = vmatpush1.bf16.msra.mxu0 %v1872_v18  ;;  %1676 = vmatprep.subr.bf16.mxu1 %v2278_v4  ;;  %v460_v48 = vrot.slane %v2664_v45, %v459_v44  ;;  %v466_v53 = vrot.slane %v2664_v45, %v465_v49 }
  0xba   : > { %636 = vmatprep.subr.bf16.mxu0 %v1874_v20 }
  0xbc   : > { %1677 = vmatpush3.bf16.msra.mxu1 %v1877_v22 }
  0xbd   : > { %637 = vmatpush1.bf16.msra.mxu0 %v1876_v21  ;;  %1678 = vmatprep.subr.bf16.mxu1 %v2278_v4 }
  0xbe   : > { %638 = vmatprep.subr.bf16.mxu0 %v1878_v23 }
  0xc0   : > { %1679 = vmatpush3.bf16.msra.mxu1 %v1881_v25  ;;  %v1895_v25 = vld [vmem:[%s2533_s7 + $0x30] sm:$0xff]  }
  0xc1   : > { %639 = vmatpush1.bf16.msra.mxu0 %v1880_v24  ;;  %1680 = vmatprep.subr.bf16.mxu1 %v2278_v4  ;;  %v1894_v24 = vld [vmem:[%s2533_s7 + $0x38] sm:$0xff]  }
  0xc2   : > { %640 = vmatprep.subr.bf16.mxu0 %v1882_v26  ;;  %v1896_v26 = vld [vmem:[%s2533_s7 + $0x28] sm:$0xff]  }
  0xc4   : > { %1681 = vmatpush3.bf16.msra.mxu1 %v1885_v29  ;;  %v1898_v29 = vld [vmem:[%s2533_s7 + $0x18] sm:$0xff]  }
  0xc5   : > { %641 = vmatpush1.bf16.msra.mxu0 %v1884_v28  ;;  %1682 = vmatprep.subr.bf16.mxu1 %v2278_v4  ;;  %v1897_v28 = vld [vmem:[%s2533_s7 + $0x20] sm:$0xff]  }
  0xc6   : > { %642 = vmatprep.subr.bf16.mxu0 %v1886_v30  ;;  %v1899_v30 = vld [vmem:[%s2533_s7 + $0x10] sm:$0xff]  }
  0xc8   : > { %1683 = vmatpush3.bf16.msra.mxu1 %v1889_v32 }
  0xc9   : > { %643 = vmatpush1.bf16.msra.mxu0 %v1888_v31  ;;  %1684 = vmatprep.subr.bf16.mxu1 %v2278_v4 }
  0xca   : > { %644 = vmatprep.subr.bf16.mxu0 %v1890_v33 }
  0xcc   : > { %1685 = vmatpush3.bf16.msra.mxu1 %v1893_v35 }
  0xcd   : > { %645 = vmatpush1.bf16.msra.mxu0 %v1892_v34  ;;  %1690 = vmatprep.subr.bf16.mxu1 %v2278_v4 }
  0xce   : > { %1702 = vmatprep.subr.bf16.mxu0 %v2278_v4 }
 0x138   : > { %v435_v6 = vpop.xlane.xlu0 %434 }
 0x139   : > { %v439_v7 = vmul.f32 0.0078125, %v435_v6 }
 0x13b   : > { %v2619_v8 = vsub.f32 %v2606_v0, %v439_v7 }
 0x13c   : > { %v437_v9 = vpop.xlane.xlu0 %436 }
 0x13d   : > { %v440_v10 = vmul.f32 0.0078125, %v437_v9  ;;  %v443_v11 = vmul.f32 %v2619_v8, %v2619_v8 }
 0x13f   : > { %v2624_v12 = vsub.f32 %v2609_v1, %v440_v10  ;;  %445 = vadd.xlane.f32.xlu1 %v443_v11 }
 0x141   : > { %v444_v13 = vmul.f32 %v2624_v12, %v2624_v12 }
 0x143   : > { %447 = vadd.xlane.f32.xlu1 %v444_v13 }
 0x1c8   : > { %v446_v36 = vpop.xlane.xlu1 %445 }
 0x1c9   : > { %v449_v37 = vmul.f32 0.0078125, %v446_v36 }
 0x1cb   : > { %v451_v38 = vadd.f32 1e-05, %v449_v37 }
 0x1cc   : > { %v448_v39 = vpop.xlane.xlu1 %447 }
 0x1cd   : > { %1942 = vrsqrt.f32 %v451_v38  ;;  %v450_v40 = vmul.f32 0.0078125, %v448_v39  ;;  %v1900_v38 = vld [vmem:[%s2533_s7 + $0x8] sm:$0xff]   ;;  %v1901_v39 = vld [vmem:[%s2533_s7] sm:$0xff]   ;;  %s1344_s7 = scalar_lea.hbm %s2882_s27, %s1624_s22 }
 0x1cf   : > { %v452_v41 = vadd.f32 1e-05, %v450_v40 }
 0x1d1   : > { %1944 = vrsqrt.f32 %v452_v41 }
 0x1da   : > { %v1943_v46 = vpop.eup %1942 }
 0x1db   : > { %v455_v47 = vmul.f32 %v1943_v46, %v2619_v8 }
 0x1dd   : > { %v461_v52 = vmul.f32 %v460_v48, %v455_v47 }
 0x1de   : > { %v1945_v50 = vpop.eup %1944 }
 0x1df   : > { %v456_v51 = vmul.f32 %v1945_v50, %v2624_v12  ;;  %v467_v55 = vadd.f32 %v466_v53, %v461_v52  ;;  %v1904_v52 = vld [vmem:[%s2537_s6 + $0x74] ss:$8 sps:$4 sm:$0xff]  }
 0x1e1   : > { %v462_v54 = vmul.f32 %v460_v48, %v456_v51  ;;  %v1902_v51 = vld [vmem:[%s2537_s6 + $0x70] ss:$8 sps:$4 sm:$0xff]  }
 0x1e3   : > { %v468_v56 = vadd.f32 %v466_v53, %v462_v54 }
 0x1e5   : > { %v469_v57 = vpack.c.bf16 %v468_v56, %v467_v55 }
 0x1e7   : > { %663 = vmatmul.mubr.bf16.vlgmr.msra.gmra.mxu0 %v469_v57  ;;  %1687 = vmatmul.mubr.bf16.vlgmr.msra.gmra.mxu1 %v469_v57 }
 0x1e8   : > { %1692 = vmatprep.mubr.msk.bf16.mxu1 %vm2280_vm0, %v2278_v4  ;;  %1718 = vmatprep.mubr.msk.bf16.mxu0 %vm2280_vm0, %v2278_v4 }
 0x1e9   : > { %1703 = vmatpush3.bf16.msra.mxu0 %v1894_v24 }
 0x1ea   : > { %1704 = vmatprep.subr.bf16.mxu0 %v2278_v4 }
 0x1ed   : > { %1705 = vmatpush3.bf16.msra.mxu0 %v1895_v25 }
 0x1ee   : > { %1706 = vmatprep.subr.bf16.mxu0 %v2278_v4 }
 0x1f1   : > { %1707 = vmatpush3.bf16.msra.mxu0 %v1896_v26 }
 0x1f2   : > { %1708 = vmatprep.subr.bf16.mxu0 %v2278_v4 }
 0x1f5   : > { %1709 = vmatpush3.bf16.msra.mxu0 %v1897_v28 }
 0x1f6   : > { %1710 = vmatprep.subr.bf16.mxu0 %v2278_v4 }
 0x1f9   : > { %1711 = vmatpush3.bf16.msra.mxu0 %v1898_v29 }
 0x1fa   : > { %1712 = vmatprep.subr.bf16.mxu0 %v2278_v4 }
 0x1fd   : > { %1713 = vmatpush3.bf16.msra.mxu0 %v1899_v30 }
 0x1fe   : > { %1714 = vmatprep.subr.bf16.mxu0 %v2278_v4 }
 0x201   : > { %1715 = vmatpush3.bf16.msra.mxu0 %v1900_v38  ;;  %v1932_v38 = vld [vmem:[%s2599_s17 + $0x60] sm:$0xff]  }
 0x202   : > { %1716 = vmatprep.subr.bf16.mxu0 %v2278_v4 }
 0x205   : > { %1717 = vmatpush3.bf16.msra.mxu0 %v1901_v39  ;;  %v1933_v39 = vld [vmem:[%s2599_s17 + $0x20] sm:$0xff]  }
 0x2a7   : > { %v664_v58 = vpop.f32.mrf.mxu0  ;;  %v707_v59 = vpop.f32.mrf.mxu1 }
 0x2a9   : > { %v666_v60 = vpop.f32.mrf.mxu0  ;;  %v1688_v61 = vpop.f32.mrf.mxu1 }
 0x2aa   : > { %v1910_v61 = vld [vmem:[%s2537_s6 + $0x54] ss:$8 sps:$4 sm:$0xff]  }
 0x2ab   : > { %v668_v62 = vpop.f32.mrf.mxu0  ;;  %v710_v63 = vpop.f32.mrf.mxu1 }
 0x2ac   : > { %v714_v6 = vpack.c.bf16 %v668_v62, %v664_v58  ;;  %v716_v7 = vpack.c.bf16 %v710_v63, %v707_v59  ;;  %v1907_v59 = vld [vmem:[%s2537_s6 + $0x64] ss:$8 sps:$4 sm:$0xff]   ;;  %v1908_v62 = vld [vmem:[%s2537_s6 + $0x50] ss:$8 sps:$4 sm:$0xff]   ;;  %v1911_v63 = vld [vmem:[%s2537_s6 + $0x40] ss:$8 sps:$4 sm:$0xff]  }
 0x2ad   : > { %v670_v2 = vpop.f32.mrf.mxu0  ;;  %v1689_v3 = vpop.f32.mrf.mxu1 }
 0x2ae   : > { %v715_v5 = vpack.c.bf16 %v670_v2, %v666_v60  ;;  %v1905_v60 = vld [vmem:[%s2537_s6 + $0x60] ss:$8 sps:$4 sm:$0xff]   ;;  %v1913_v2 = vld [vmem:[%s2537_s6 + $0x44] ss:$8 sps:$4 sm:$0xff]   ;;  %v1916_v3 = vld [vmem:[%s2537_s6 + $0x34] ss:$8 sps:$4 sm:$0xff]  }
 0x2b0   : > { %1691 = vmatpush3.bf16.xpose.msra.mxu1 %v715_v5  ;;  %v1914_v5 = vld [vmem:[%s2537_s6 + $0x30] ss:$8 sps:$4 sm:$0xff]  }
 0x2b1   : > { %1696 = vmatprep.subr.bf16.mxu1 %v2278_v4 }
 0x2b7   : > { %1693 = vmatmul.mubr.bf16.vlgmr.msra.gmra.mxu1 %v714_v6  ;;  %v1919_v6 = vld [vmem:[%s2537_s6 + $0x24] ss:$8 sps:$4 sm:$0xff]  }
 0x2b8   : > { %1697 = vmatpush3.bf16.msra.mxu1 %v716_v7  ;;  %1698 = vmatprep.mubr.msk.bf16.mxu1 %vm2280_vm0, %v2278_v4  ;;  %v1917_v7 = vld [vmem:[%s2537_s6 + $0x20] ss:$8 sps:$4 sm:$0xff]  }
 0x2b9   : > { %1073 = vmatprep.subr.bf16.mxu1 %v1904_v52 }
 0x377   : > { %v751_v8 = vpop.f32.mrf.mxu1 }
 0x378   : > { %v759_v9 = vsel %vm758_vm1, %v751_v8, -inf }
 0x379   : > { %760 = vmax.xlane.f32.xlu0 %v759_v9  ;;  %v1694_v10 = vpop.f32.mrf.mxu1  ;;  %v1920_v9 = vld [vmem:[%s2537_s6 + $0x10] ss:$8 sps:$4 sm:$0xff]  }
 0x37a   : > { %v1925_v10 = vld [vmem:[%s2537_s6 + $0x4] ss:$8 sps:$4 sm:$0xff]  }
 0x37b   : > { %v754_v11 = vpop.f32.mrf.mxu1 }
 0x37c   : > { %v762_v12 = vsel %vm758_vm1, %v754_v11, -inf }
 0x37d   : > { %763 = vmax.xlane.f32.xlu1 %v762_v12  ;;  %v1695_v13 = vpop.f32.mrf.mxu1 }
 0x402   : > { %v761_v14 = vpop.xlane.xlu0 %760 }
 0x403   : > { %v765_v15 = vsub.f32 %v751_v8, %v761_v14  ;;  %v1922_v8 = vld [vmem:[%s2537_s6 + $0x14] ss:$8 sps:$4 sm:$0xff]  }
 0x405   : > { %v767_v16 = vmul.f32 1.442695, %v765_v15 }
 0x406   : > { %v764_v17 = vpop.xlane.xlu1 %763 }
 0x407   : > { %1946 = vpow2.f32 %v767_v16  ;;  %v766_v18 = vsub.f32 %v754_v11, %v764_v17  ;;  %v1923_v11 = vld [vmem:[%s2537_s6] ss:$8 sps:$4 sm:$0xff]   ;;  %s2883_s6 = smov %s2882_s27 }
 0x409   : > { %v769_v19 = vmul.f32 1.442695, %v766_v18  ;;  %v958_v18 = vsub.s32 2, %v2660_v43 }
 0x40b   : > { %1948 = vpow2.f32 %v769_v19 }
 0x414   : > { %v1947_v20 = vpop.eup %1946 }
 0x415   : > { %v771_v21 = vsel %vm758_vm1, %v1947_v20, 0.0 }
 0x416   : > { %772 = vadd.xlane.f32.xlu0 %v771_v21  ;;  %v959_v21 = vrot.slane %v2664_v45, %v958_v18 }
 0x418   : > { %v1949_v22 = vpop.eup %1948 }
 0x419   : > { %v774_v23 = vsel %vm758_vm1, %v1949_v22, 0.0 }
 0x41a   : > { %775 = vadd.xlane.f32.xlu1 %v774_v23 }
 0x49f   : > { %v773_v31 = vpop.xlane.xlu0 %772 }
 0x4a0   : > { %1950 = vrcp.f32 %v773_v31 }
 0x4a3   : > { %v776_v32 = vpop.xlane.xlu1 %775 }
 0x4a4   : > { %1952 = vrcp.f32 %v776_v32  ;;  %v1926_v32 = vld [vmem:[%s2599_s17 + $0x78] sm:$0xff]  }
 0x4a5   : > { %1648 = vmatprep.subr.bf16.mxu0 %v1926_v32 }
 0x4ad   : > { %v1951_v33 = vpop.eup %1950 }
 0x4ae   : > { %v779_v35 = vmul.f32 %v1951_v33, %v1947_v20  ;;  %v1927_v33 = vld [vmem:[%s2599_s17 + $0x38] sm:$0xff]  }
 0x4b1   : > { %v1953_v34 = vpop.eup %1952 }
 0x4b2   : > { %v780_v36 = vmul.f32 %v1953_v34, %v1949_v22  ;;  %v964_v22 = vsub.s32 3, %v2660_v43  ;;  %v1928_v34 = vld [vmem:[%s2599_s17 + $0x70] sm:$0xff]  }
 0x4b4   : > { %v781_v37 = vpack.c.bf16 %v780_v36, %v779_v35  ;;  %v965_v26 = vrot.slane %v2664_v45, %v964_v22  ;;  %v1929_v35 = vld [vmem:[%s2599_s17 + $0x30] sm:$0xff]   ;;  %v1930_v36 = vld [vmem:[%s2599_s17 + $0x68] sm:$0xff]  }
 0x4b6   : > { %1699 = vmatmul.mubr.msk.bf16.vlgmr.msra.gmra.mxu1 %vm758_vm1, %v781_v37  ;;  %v1931_v37 = vld [vmem:[%s2599_s17 + $0x28] sm:$0xff]  }
 0x4b7   : > { %1105 = vmatprep.mubr.bf16.mxu1 %v2279_v27  ;;  %1074 = vmatpush1.bf16.msra.mxu1 %v1902_v51  ;;  %v433_v51 = vld [vmem:[%s2517_s18 + $0x8] sm:$0xff] }
 0x4b8   : > { %1075 = vmatprep.subr.bf16.mxu1 %v1907_v59 }
 0x4bb   : > { %1076 = vmatpush1.bf16.msra.mxu1 %v1905_v60 }
 0x4bc   : > { %1077 = vmatprep.subr.bf16.mxu1 %v1910_v61 }
 0x4bf   : > { %1078 = vmatpush1.bf16.msra.mxu1 %v1908_v62 }
 0x4c0   : > { %1079 = vmatprep.subr.bf16.mxu1 %v1913_v2 }
 0x4c3   : > { %1080 = vmatpush1.bf16.msra.mxu1 %v1911_v63 }
 0x4c4   : > { %1081 = vmatprep.subr.bf16.mxu1 %v1916_v3 }
 0x4c7   : > { %1082 = vmatpush1.bf16.msra.mxu1 %v1914_v5 }
 0x4c8   : > { %1083 = vmatprep.subr.bf16.mxu1 %v1919_v6 }
 0x4cb   : > { %1084 = vmatpush1.bf16.msra.mxu1 %v1917_v7 }
 0x4cc   : > { %1085 = vmatprep.subr.bf16.mxu1 %v1922_v8 }
 0x4cf   : > { %1086 = vmatpush1.bf16.msra.mxu1 %v1920_v9 }
 0x4d0   : > { %1087 = vmatprep.subr.bf16.mxu1 %v1925_v10 }
 0x4d3   : > { %1088 = vmatpush1.bf16.msra.mxu1 %v1923_v11 }
 0x576   : > { %v819_v40 = vpop.f32.mrf.mxu1 }
 0x578   : > { %v1700_v41 = vpop.f32.mrf.mxu1 }
 0x579   : > { %v1935_v41 = vld [vmem:[%s2599_s17 + $0x18] sm:$0xff]  }
 0x57a   : > { %v822_v42 = vpop.f32.mrf.mxu1 }
 0x57b   : > { %v826_v44 = vpack.c.bf16 %v822_v42, %v819_v40  ;;  %v1934_v40 = vld [vmem:[%s2599_s17 + $0x58] sm:$0xff]   ;;  %v1936_v42 = vld [vmem:[%s2599_s17 + $0x50] sm:$0xff]  }
 0x57c   : > { %v1701_v46 = vpop.f32.mrf.mxu1 }
 0x57d   : > { %1719 = vmatmul.mubr.bf16.vlgmr.msra.gmra.mxu0 %v826_v44  ;;  %v1937_v44 = vld [vmem:[%s2599_s17 + $0x10] sm:$0xff]   ;;  %v1938_v46 = vld [vmem:[%s2599_s17 + $0x48] sm:$0xff]  }
 0x57e   : > { %1649 = vmatpush3.bf16.msra.mxu0 %v1927_v33 }
 0x57f   : > { %1650 = vmatprep.subr.bf16.mxu0 %v1928_v34 }
 0x582   : > { %1651 = vmatpush3.bf16.msra.mxu0 %v1929_v35 }
 0x583   : > { %1652 = vmatprep.subr.bf16.mxu0 %v1930_v36 }
 0x586   : > { %1653 = vmatpush3.bf16.msra.mxu0 %v1931_v37 }
 0x587   : > { %1654 = vmatprep.subr.bf16.mxu0 %v1932_v38  ;;  %v1188_v38 = vsub.s32 5, %v2660_v43 }
 0x58a   : > { %1655 = vmatpush3.bf16.msra.mxu0 %v1933_v39 }
 0x58b   : > { %1656 = vmatprep.subr.bf16.mxu0 %v1934_v40  ;;  %v1189_v40 = vrot.slane %v2664_v45, %v1188_v38 }
 0x58e   : > { %1657 = vmatpush3.bf16.msra.mxu0 %v1935_v41 }
 0x58f   : > { %1658 = vmatprep.subr.bf16.mxu0 %v1936_v42 }
 0x592   : > { %1659 = vmatpush3.bf16.msra.mxu0 %v1937_v44 }
 0x593   : > { %1660 = vmatprep.subr.bf16.mxu0 %v1938_v46 }
 0x63d   : > { %v925_v47 = vpop.f32.mrf.mxu0 }
 0x63e   : > { %v2700_v48 = vadd.f32 %v925_v47, %v2606_v0  ;;  %v1939_v47 = vld [vmem:[%s2599_s17 + $0x8] sm:$0xff]  }
 0x63f   : > { %v1720_v49 = vpop.f32.mrf.mxu0  ;;  %1661 = vmatpush3.bf16.msra.mxu0 %v1939_v47 }
 0x640   : > { %934 = vadd.xlane.f32.xlu0 %v2700_v48  ;;  %v1940_v49 = vld [vmem:[%s2599_s17 + $0x40] sm:$0xff]  }
 0x641   : > { %v928_v27 = vpop.f32.mrf.mxu0  ;;  %1662 = vmatprep.subr.bf16.mxu0 %v1940_v49 }
 0x642   : > { %v2704_v4 = vadd.f32 %v928_v27, %v2609_v1  ;;  %v1941_v27 = vld [vmem:[%s2599_s17] sm:$0xff]  }
 0x643   : > { %v1721_v50 = vpop.f32.mrf.mxu0  ;;  %1663 = vmatpush3.bf16.msra.mxu0 %v1941_v27 }
 0x644   : > { %936 = vadd.xlane.f32.xlu1 %v2704_v4  ;;  %v987_v50 = vsub.s32 4, %v2660_v43 }
 0x646   : > { %v988_v52 = vrot.slane %v2664_v45, %v987_v50 }
 0x6c9   : > { %v935_v0 = vpop.xlane.xlu0 %934 }
 0x6ca   : > { %v938_v53 = vmul.f32 0.0078125, %v935_v0  ;;  %v992_v0 = vrot.slane %v433_v51, %v987_v50 }
 0x6cc   : > { %v940_v54 = vsub.f32 %v2700_v48, %v938_v53 }
 0x6cd   : > { %v937_v55 = vpop.xlane.xlu1 %936 }
 0x6ce   : > { %v939_v1 = vmul.f32 0.0078125, %v937_v55  ;;  %v942_v56 = vmul.f32 %v940_v54, %v940_v54 }
 0x6d0   : > { %v941_v57 = vsub.f32 %v2704_v4, %v939_v1  ;;  %944 = vadd.xlane.f32.xlu0 %v942_v56 }
 0x6d2   : > { %v943_v58 = vmul.f32 %v941_v57, %v941_v57 }
 0x6d4   : > { %946 = vadd.xlane.f32.xlu1 %v943_v58 }
 0x759   : > { %v945_v12 = vpop.xlane.xlu0 %944 }
 0x75a   : > { %v948_v13 = vmul.f32 0.0078125, %v945_v12 }
 0x75c   : > { %v950_v14 = vadd.f32 1e-05, %v948_v13 }
 0x75d   : > { %v947_v15 = vpop.xlane.xlu1 %946 }
 0x75e   : > { %1954 = vrsqrt.f32 %v950_v14  ;;  %v949_v16 = vmul.f32 0.0078125, %v947_v15 }
 0x760   : > { %v951_v17 = vadd.f32 1e-05, %v949_v16 }
 0x762   : > { %1956 = vrsqrt.f32 %v951_v17 }
 0x76b   : > { %v1955_v19 = vpop.eup %1954 }
 0x76c   : > { %v954_v20 = vmul.f32 %v1955_v19, %v940_v54 }
 0x76e   : > { %v960_v25 = vmul.f32 %v959_v21, %v954_v20 }
 0x76f   : > { %v1957_v23 = vpop.eup %1956 }
 0x770   : > { %v955_v24 = vmul.f32 %v1957_v23, %v941_v57  ;;  %v966_v29 = vadd.f32 %v965_v26, %v960_v25 }
 0x772   : > { %v961_v28 = vmul.f32 %v959_v21, %v955_v24 }
 0x774   : > { %v967_v30 = vadd.f32 %v965_v26, %v961_v28 }
 0x776   : > { %v968_v31 = vpack.c.bf16 %v967_v30, %v966_v29 }
 0x778   : > { %1106 = vmatmul.mubr.bf16.vlgmr.msra.gmra.mxu1 %v968_v31 }
 0x838   : > { %v1107_v53 = vpop.f32.mrf.mxu1 }
 0x839   : > { %v1108_v54 = vadd.f32 %v1107_v53, %v988_v52 }
 0x83a   : > { %v1109_v55 = vpop.f32.mrf.mxu1 }
 0x83b   : > { %v1116_v1 = vmul.f32 %v1108_v54, %v1108_v54  ;;  %v1110_v56 = vadd.f32 %v1109_v55, %v992_v0 }
 0x83c   : > { %v1111_v57 = vpop.f32.mrf.mxu1 }
 0x83d   : > { %v1120_v58 = vmul.f32 %v1116_v1, %v1108_v54  ;;  %v1117_v59 = vmul.f32 %v1110_v56, %v1110_v56  ;;  %v1112_v60 = vadd.f32 %v1111_v57, %v988_v52 }
 0x83e   : > { %v1113_v61 = vpop.f32.mrf.mxu1 }
 0x83f   : > { %v1124_v62 = vmul.f32 0.044715, %v1120_v58  ;;  %v1121_v63 = vmul.f32 %v1117_v59, %v1110_v56  ;;  %v1118_v2 = vmul.f32 %v1112_v60, %v1112_v60  ;;  %v1114_v3 = vadd.f32 %v1113_v61, %v992_v0 }
 0x841   : > { %v1128_v5 = vadd.f32 %v1124_v62, %v1108_v54  ;;  %v1125_v6 = vmul.f32 0.044715, %v1121_v63  ;;  %v1122_v7 = vmul.f32 %v1118_v2, %v1112_v60  ;;  %v1119_v8 = vmul.f32 %v1114_v3, %v1114_v3 }
 0x843   : > { %v1132_v9 = vmul.f32 0.7978846, %v1128_v5  ;;  %v1129_v10 = vadd.f32 %v1125_v6, %v1110_v56  ;;  %v1126_v11 = vmul.f32 0.044715, %v1122_v7  ;;  %v1123_v12 = vmul.f32 %v1119_v8, %v1114_v3 }
 0x845   : > { %v1133_v13 = vmul.f32 0.7978846, %v1129_v10  ;;  %v1130_v14 = vadd.f32 %v1126_v11, %v1112_v60  ;;  %v1127_v15 = vmul.f32 0.044715, %v1123_v12  ;;  %1958 = vtanh.f32 %v1132_v9 }
 0x847   : > { %1960 = vtanh.f32 %v1133_v13  ;;  %v1134_v16 = vmul.f32 0.7978846, %v1130_v14  ;;  %v1131_v17 = vadd.f32 %v1127_v15, %v1114_v3 }
 0x849   : > { %1962 = vtanh.f32 %v1134_v16  ;;  %v1135_v18 = vmul.f32 0.7978846, %v1131_v17 }
 0x84b   : > { %1964 = vtanh.f32 %v1135_v18 }
 0x852   : > { %v1959_v19 = vpop.eup %1958 }
 0x853   : > { %v1140_v23 = vadd.f32 1.0, %v1959_v19 }
 0x854   : > { %v1961_v20 = vpop.eup %1960 }
 0x855   : > { %v1141_v21 = vadd.f32 1.0, %v1961_v20  ;;  %v1144_v30 = vmul.f32 0.5, %v1140_v23 }
 0x856   : > { %v1963_v22 = vpop.eup %1962 }
 0x857   : > { %v1142_v24 = vadd.f32 1.0, %v1963_v22  ;;  %v1145_v29 = vmul.f32 0.5, %v1141_v21  ;;  %v1148_v35 = vmul.f32 %v1144_v30, %v1108_v54 }
 0x858   : > { %v1965_v25 = vpop.eup %1964 }
 0x859   : > { %v1146_v26 = vmul.f32 0.5, %v1142_v24  ;;  %v1143_v28 = vadd.f32 1.0, %v1965_v25  ;;  %v1149_v33 = vmul.f32 %v1145_v29, %v1110_v56 }
 0x85b   : > { %v1147_v31 = vmul.f32 0.5, %v1143_v28  ;;  %v1150_v32 = vmul.f32 %v1146_v26, %v1112_v60 }
 0x85d   : > { %v1151_v34 = vmul.f32 %v1147_v31, %v1114_v3  ;;  %v1152_v37 = vpack.c.bf16 %v1150_v32, %v1148_v35 }
 0x85f   : > { %v1153_v36 = vpack.c.bf16 %v1151_v34, %v1149_v33 }
 0x861   : > { %1318 = vmatprep.mubr.bf16.mxu0 %v1153_v36 }
 0x862   : > { %1319 = vmatmul.mubr.bf16.vlgmr.msra.gmra.mxu0 %v1152_v37 }
 0x922   : > { %v1664_v39 = vpop.f32.mrf.mxu0 }
 0x924   : > { %v1665_v41 = vpop.f32.mrf.mxu0 }
 0x925   : > { %v1666_v42 = vadd.f32 %v1665_v41, %v1664_v39 }
 0x926   : > { %v1667_v44 = vpop.f32.mrf.mxu0 }
 0x927   : > { %v1321_v46 = vadd.f32 %v1666_v42, %v1189_v40 }
 0x928   : > { %v1668_v47 = vpop.f32.mrf.mxu0 }
 0x929   : > { %v1327_v49 = vadd.f32 %v1321_v46, %v2700_v48  ;;  %v1669_v27 = vadd.f32 %v1668_v47, %v1667_v44 }
 0x92b   : > { %1329 = vst [vmem:[%s2548_s28] sm:$0xff] %v1327_v49  ;;  %v1324_v50 = vadd.f32 %v1669_v27, %v1189_v40 }
 0x92d   : > { %v1328_v43 = vadd.f32 %v1324_v50, %v2704_v4 }
 0x92f   : > { %1330 = vst [vmem:[%s2548_s28 + $0x8] sm:$0xff] %v1328_v43 }
 0x930   : > { %2145 = shalt.err (!%p2142_p13)
}
 0x931   : > { %s2146_s13 = scalar_lea.hbm %s1344_s7, 256  ;;  %s2150_s12 = scalar_lea.hbm %s2883_s6, 512 }
 0x932   : > { %p2147_p0 = scmp.ne.s32.totalorder %s1344_s7, %s2146_s13  ;;  %p2151_p7 = scmp.lt.s32.totalorder %s1344_s7, %s2883_s6 }
 0x933   : > { %p2152_p10 = scmp.lt.s32.totalorder %s2150_s12, %s2146_s13 }
 0x934   : > { %p2148_p1 = pnand %p2147_p0, %p2410_p12 }
 0x935   : > { %p2153_p3 = por %p2152_p10, %p2151_p7 }
 0x936   : > { %p2149_p9 = pneg %p2148_p1 }
 0x938   : > { %p2154_p4 = pnand %p2153_p3, %p2149_p9 }
 0x93a   : > { %2157 = shalt.err (!%p2154_p4)
}
 0x93b   : > { %s2281_s20 = smov 128   ;;  %s2282_s23 = smov 8  }
 0x93c   : > { %1738 = dma.vmem_to_hbm [thread:$0]  (%p2410_p12), %s2556_s8, 256, %s1344_s7, %s1332_s10, %s2281_s20, %s2281_s20, %s2282_s23  }
 0x93d PF: > { %s2884_s11 = sld [smem:[#allocation29_spill]] }
 0x93e   : > { %s2885_s4 = sld [smem:[#allocation22_spill]] }
 0x943   : > { %p1762_p5 = scmp.ge.s32.totalorder %s2884_s11, 2 }
 0x944   : > { %s1360_s15 = sand.u32 1, %s2885_s4  }
 0x945   : > { %p1757_p8 = pnand %p1762_p5, %p2420_p2  ;;  %s1361_s2 = scalar_lea.sflag [#allocation5], %s1360_s15 }
 0x947   : > { %p1758_p6 = pneg %p1757_p8 }
 0x949   : > { %2219 = dma.done.wait (%p1758_p6), %s1361_s2, 256  }
 0x94a   : > { %2221 = vsyncadd (%p1758_p6), %s1361_s2, 4294967040  ;;  %s28_s7 = sadd.s32 1, %s2884_s11   ;;  %s2887_s21 = sld [smem:[#allocation23_spill]] }
 0x94b   : > { %p25_p11 = scmp.ge.s32.totalorder %s28_s7, 8   ;;  %s2888_s22 = sld [smem:[#allocation24_spill]] }
 0x94c   : > { %s2889_s23 = sld [smem:[#allocation34_spill]]  ;;  %s2895_s24 = smov %s2240_s25 }
 0x94d   : > { %s2890_s8 = sld [smem:[#allocation25_spill]]  ;;  %s2897_s27 = smov %s2256_s29 }
 0x94e   : > { %s2891_s26 = sld [smem:[#allocation33_spill]] }
 0x94f   : > { %s2892_s28 = sld [smem:[#allocation28_spill]] }
 0x950   : > { %s2893_s14 = sld [smem:[#allocation31_spill]] }
 0x951   : > { %s2894_s30 = sld [smem:[#allocation32_spill]] }
 0x952   :  { %27 = sbr.rel (!%p25_p11) target bundleno = 18 (0x12), region = 142 }
 0x953   : > { %s2896_s25 = smov %s2890_s8 }
 0x956   : > { %s2898_s29 = smov %s2893_s14 }
 0x957   :  { %1366 = vsyncpa [#allocation4], 1 }
 0x958   :  { %1368 = vsyncpa [#allocation4 + $0x1], 1 }
 0x959   :  { %1369 = vsyncpa [#allocation7], 1 }
 0x95a   :  { %1371 = vsyncpa [#allocation7 + $0x1], 1 }
 0x95b   :  { %1372 = vsyncpa [#allocation10], 1 }
 0x95c   :  { %1374 = vsyncpa [#allocation10 + $0x1], 1 }
 0x95d   :  { %1375 = vsyncpa [#allocation5], 1 }
 0x95e   :  { %1377 = vsyncpa [#allocation5 + $0x1], 1 }
 0x95f   :  { %1378 = vsyncmov [#allocation2] }
 0x962   :  { %s1379_s17 = vpop.sfrf %1378 }
 0x963   :  { %p1619_p12 = scmp.ne.s32.totalorder %s1379_s17, 0 }
 0x965   :  { %1383 = shalt.err (%p1619_p12)  }

</bundles_post_ra>
